<compile_context>
chip_gen: v6e
topology: v6e:2x2x1
jax: 0.10.0
libtpu: 0.0.40
codegen_flags: <defaults>
</compile_context>

<pallas_src>
import jax
import jax.numpy as jnp
from jax.experimental import pallas as pl
from jax.experimental.pallas import tpu as pltpu


def _conv_rnn_kernel(x_ref, h_ref, wx_ref, wh_ref, b_ref, o_ref):
    # x_ref:  (1, Cin, TS)   h_ref: (1, Cout, TS)
    # wx_ref: (Cout, Cin)    wh_ref: (Cout, Cout)   b_ref: (Cout, 1)
    # o_ref:  (1, Cout, TS)  -- lane-dense last dim (TS is a multiple of 128
    #                            or the full spatial extent)
    acc = jnp.dot(wx_ref[...], x_ref[0], preferred_element_type=jnp.float32)
    acc = acc + jnp.dot(wh_ref[...], h_ref[0], preferred_element_type=jnp.float32)
    acc = acc + b_ref[...]          # (Cout, 1) broadcasts over the lane axis
    o_ref[0] = acc.astype(o_ref.dtype)


def _pick_tile_s(s, n, max_tile=8192, min_total_steps=2):
    """Largest lane-aligned (multiple of 128) tile that divides S exactly.

    Avoids any jnp.pad copy. Falls back to the full spatial extent when S is
    not a multiple of 128 (a block dim equal to the full array dim is legal).
    Shrinks the tile if needed so the grid has >= 2 steps (v7x has 2 TCs).
    """
    if s % 128 != 0:
        return s
    cap = min(max_tile, s)
    cap -= cap % 128
    tile = 128
    t = cap
    while t >= 128:
        if s % t == 0:
            tile = t
            break
        t -= 128
    while (n * (s // tile) < min_total_steps and tile % 256 == 0
           and s % (tile // 2) == 0):
        tile //= 2
    return tile


def conv_rnn_cell(x, hidden, weight, bias, *, max_tile_s=8192):
    """Forward of ConvRnnCell.

    Args:
      x:      (N, Cin, H, W)
      hidden: (N, Cout, H, W)
      weight: (Cout, Cin + Cout, 1, 1)  -- PyTorch Conv2d weight layout
      bias:   (Cout,)
    Returns:
      (out, hidden), both (N, Cout, H, W), with hidden == out.
    """
    n, cin, hgt, wid = x.shape
    cout = hidden.shape[1]
    s = hgt * wid

    # Free reshapes (NCHW is already channel-major): no transposes, no pads.
    x3 = x.reshape(n, cin, s)
    h3 = hidden.reshape(n, cout, s)

    # Conv weight (Cout, Cin+Cout, 1, 1) -> split matmul weights (concat folded).
    w2d = weight.reshape(cout, cin + cout)
    wx = w2d[:, :cin]            # (Cout, Cin)
    wh = w2d[:, cin:]            # (Cout, Cout)
    b2 = bias.reshape(cout, 1)   # broadcast over the lane (spatial) axis

    tile_s = _pick_tile_s(s, n, max_tile=max_tile_s)
    grid = (n, s // tile_s)

    out3 = pl.pallas_call(
        _conv_rnn_kernel,
        out_shape=jax.ShapeDtypeStruct((n, cout, s), x.dtype),
        grid_spec=pltpu.PrefetchScalarGridSpec(
            num_scalar_prefetch=0,
            grid=grid,
            in_specs=[
                pl.BlockSpec((1, cin, tile_s), lambda i, j: (i, 0, j)),
                pl.BlockSpec((1, cout, tile_s), lambda i, j: (i, 0, j)),
                pl.BlockSpec((cout, cin), lambda i, j: (0, 0)),
                pl.BlockSpec((cout, cout), lambda i, j: (0, 0)),
                pl.BlockSpec((cout, 1), lambda i, j: (0, 0)),
            ],
            out_specs=pl.BlockSpec((1, cout, tile_s), lambda i, j: (i, 0, j)),
        ),
        # hidden becomes the new hidden/out: write in place (free when donated).
        input_output_aliases={1: 0},
        compiler_params=pltpu.CompilerParams(
            dimension_semantics=("parallel", "parallel")),
    )(x3, h3, wx, wh, b2)

    out = out3.reshape(n, cout, hgt, wid)   # free reshape back to NCHW
    return out, out


if __name__ == "__main__":
    key = jax.random.PRNGKey(0)
    k_x, k_h, k_w, k_b = jax.random.split(key, 4)

    # Small shapes consistent with the module's forward.
    N, Cin, Cout, H, W = 2, 4, 8, 16, 16

    x = jax.random.normal(k_x, (N, Cin, H, W), dtype=jnp.float32)
    hidden = jax.random.normal(k_h, (N, Cout, H, W), dtype=jnp.float32)

    # Deterministic parameter init (Conv2d(Cin+Cout, Cout, kernel_size=1)).
    fan_in = Cin + Cout
    bound = 1.0 / jnp.sqrt(jnp.float32(fan_in))
    weight = jax.random.uniform(
        k_w, (Cout, Cin + Cout, 1, 1), minval=-bound, maxval=bound,
        dtype=jnp.float32)
    bias = jax.random.uniform(
        k_b, (Cout,), minval=-bound, maxval=bound, dtype=jnp.float32)

    out, new_hidden = conv_rnn_cell(x, hidden, weight, bias)
    jax.block_until_ready((out, new_hidden))

    # Reference check in plain JAX (1x1 conv == channel matmul).
    cat = jnp.concatenate([x, hidden], axis=1)                       # (N, Cin+Cout, H, W)
    ref = jnp.einsum("nchw,oc->nohw", cat, weight.reshape(Cout, -1)) \
          + bias.reshape(1, Cout, 1, 1)
    assert out.shape == (N, Cout, H, W)
    assert jnp.allclose(out, ref, atol=1e-5, rtol=1e-5)
    assert jnp.allclose(out, new_hidden)

    print("KERNEL_OK")
</pallas_src>

<mosaic_0001>
module attributes {stable_mosaic.version = 11 : i64} {
  func.func @_conv_rnn_kernel(%arg0: i32, %arg1: i32, %arg2: memref<1x4x256xf32, #tpu.memory_space<vmem>>, %arg3: memref<1x8x256xf32, #tpu.memory_space<vmem>>, %arg4: memref<8x4xf32, #tpu.memory_space<vmem>>, %arg5: memref<8x8xf32, #tpu.memory_space<vmem>>, %arg6: memref<8x1xf32, #tpu.memory_space<vmem>>, %arg7: memref<1x8x256xf32, #tpu.memory_space<vmem>>) attributes {dimension_semantics = [#tpu.dimension_semantics<parallel>, #tpu.dimension_semantics<parallel>], iteration_bounds = array<i64: 2, 1>, scalar_prefetch = 0 : i64, scratch_operands = 0 : i64, tpu.core_type = #tpu.core_type<tc>, window_params = [{transform_indices = @transform_0, window_bounds = array<i64: 1, 4, 256>}, {transform_indices = @transform_1, window_bounds = array<i64: 1, 8, 256>}, {pipeline_mode = #tpu.pipeline_mode<synchronous>, transform_indices = @transform_2, window_bounds = array<i64: 8, 4>}, {pipeline_mode = #tpu.pipeline_mode<synchronous>, transform_indices = @transform_3, window_bounds = array<i64: 8, 8>}, {pipeline_mode = #tpu.pipeline_mode<synchronous>, transform_indices = @transform_4, window_bounds = array<i64: 8, 1>}, {transform_indices = @transform_5, window_bounds = array<i64: 1, 8, 256>}]} {
    %c0 = arith.constant 0 : index
    %c0_0 = arith.constant 0 : index
    %0 = vector.load %arg4[%c0, %c0_0] : memref<8x4xf32, #tpu.memory_space<vmem>>, vector<8x4xf32>
    %c0_1 = arith.constant 0 : index
    %c0_2 = arith.constant 0 : index
    %c0_3 = arith.constant 0 : index
    %1 = vector.load %arg2[%c0_1, %c0_2, %c0_3] : memref<1x4x256xf32, #tpu.memory_space<vmem>>, vector<1x4x256xf32>
    %2 = vector.shape_cast %1 : vector<1x4x256xf32> to vector<4x256xf32>
    %cst = arith.constant dense<0.000000e+00> : vector<8x256xf32>
    %3 = tpu.matmul %0, %2, %cst {dimension_numbers = #tpu.dot_dimension_numbers<[1], [0], [0], [1], [0, 0, 1, 1], [], []>} : vector<8x4xf32>, vector<4x256xf32>, vector<8x256xf32> -> vector<8x256xf32>
    %c0_4 = arith.constant 0 : index
    %c0_5 = arith.constant 0 : index
    %4 = vector.load %arg5[%c0_4, %c0_5] : memref<8x8xf32, #tpu.memory_space<vmem>>, vector<8x8xf32>
    %c0_6 = arith.constant 0 : index
    %c0_7 = arith.constant 0 : index
    %c0_8 = arith.constant 0 : index
    %5 = vector.load %arg3[%c0_6, %c0_7, %c0_8] : memref<1x8x256xf32, #tpu.memory_space<vmem>>, vector<1x8x256xf32>
    %6 = vector.shape_cast %5 : vector<1x8x256xf32> to vector<8x256xf32>
    %cst_9 = arith.constant dense<0.000000e+00> : vector<8x256xf32>
    %7 = tpu.matmul %4, %6, %cst_9 {dimension_numbers = #tpu.dot_dimension_numbers<[1], [0], [0], [1], [0, 0, 1, 1], [], []>} : vector<8x8xf32>, vector<8x256xf32>, vector<8x256xf32> -> vector<8x256xf32>
    %8 = arith.addf %3, %7 : vector<8x256xf32>
    %c0_10 = arith.constant 0 : index
    %c0_11 = arith.constant 0 : index
    %9 = vector.load %arg6[%c0_10, %c0_11] : memref<8x1xf32, #tpu.memory_space<vmem>>, vector<8x1xf32>
    %10 = vector.broadcast %9 : vector<8x1xf32> to vector<8x256xf32>
    %11 = arith.addf %8, %10 : vector<8x256xf32>
    %c0_12 = arith.constant 0 : index
    %c0_13 = arith.constant 0 : index
    %c0_14 = arith.constant 0 : index
    %12 = vector.load %arg7[%c0_12, %c0_13, %c0_14] : memref<1x8x256xf32, #tpu.memory_space<vmem>>, vector<1x8x256xf32>
    %13 = vector.shape_cast %12 : vector<1x8x256xf32> to vector<8x256xf32>
    %14 = vector.shape_cast %11 : vector<8x256xf32> to vector<1x8x256xf32>
    tpu.vector_store %arg7[%c0_12, %c0_13, %c0_14], %14 {strides = array<i32>} : memref<1x8x256xf32, #tpu.memory_space<vmem>>, vector<1x8x256xf32>,
    return
  }
  func.func @transform_0(%arg0: i32, %arg1: i32) -> (i32, i32, i32) {
    %c0_i32 = arith.constant 0 : i32
    %c0_i32_0 = arith.constant 0 : i32
    return %arg0, %c0_i32, %arg1 : i32, i32, i32
  }
  func.func @transform_1(%arg0: i32, %arg1: i32) -> (i32, i32, i32) {
    %c0_i32 = arith.constant 0 : i32
    %c0_i32_0 = arith.constant 0 : i32
    return %arg0, %c0_i32, %arg1 : i32, i32, i32
  }
  func.func @transform_2(%arg0: i32, %arg1: i32) -> (i32, i32) {
    %c0_i32 = arith.constant 0 : i32
    %c0_i32_0 = arith.constant 0 : i32
    %c0_i32_1 = arith.constant 0 : i32
    return %c0_i32, %c0_i32_0 : i32, i32
  }
  func.func @transform_3(%arg0: i32, %arg1: i32) -> (i32, i32) {
    %c0_i32 = arith.constant 0 : i32
    %c0_i32_0 = arith.constant 0 : i32
    %c0_i32_1 = arith.constant 0 : i32
    return %c0_i32, %c0_i32_0 : i32, i32
  }
  func.func @transform_4(%arg0: i32, %arg1: i32) -> (i32, i32) {
    %c0_i32 = arith.constant 0 : i32
    %c0_i32_0 = arith.constant 0 : i32
    %c0_i32_1 = arith.constant 0 : i32
    return %c0_i32, %c0_i32_0 : i32, i32
  }
  func.func @transform_5(%arg0: i32, %arg1: i32) -> (i32, i32, i32) {
    %c0_i32 = arith.constant 0 : i32
    %c0_i32_0 = arith.constant 0 : i32
    return %arg0, %c0_i32, %arg1 : i32, i32, i32
  }
}

</mosaic_0001>

<bundles_post_ra>
// kernel: tpu_custom_call.1
= control target key start
LH: loop header
LB: loop body
LE: loop exit
PB: predicated region body
PF: predicated region fallthrough
CT: control target
= control target key end

     0   :  { %10 = vsyncpa [#allocation3], 0  ;;  %s974_s0 = inlined_call_operand.vmem [shape: f32[2,4,256], index: 0, kind: input, shape index: {}]   ;;  %s975_s1 = inlined_call_operand.hbm [shape: f32[2,8,256], index: 1, kind: input, shape index: {}, may-alias: {1,5}]   ;;  %s976_s2 = inlined_call_operand.vmem [shape: f32[8,4], index: 2, kind: input, shape index: {}]   ;;  %s977_s3 = inlined_call_operand.vmem [shape: f32[8,8], index: 3, kind: input, shape index: {}]   ;;  %s978_s4 = inlined_call_operand.vmem [shape: f32[8,1], index: 4, kind: input, shape index: {}]   ;;  %s979_s5 = inlined_call_operand.hbm [shape: f32[2,8,256], index: 5, kind: output, shape index: {}, may-alias: {1,5}]  }
   0x1   :  { %12 = vsyncpa [#allocation3 + $0x1], 0 }
   0x2   :  { %13 = vsyncpa [#allocation4], 0 }
   0x3   :  { %15 = vsyncpa [#allocation4 + $0x1], 0  ;;  %s822_s18 = smov 0   ;;  %s824_s19 = smov 0  }
   0x4   :  { %s826_s20 = smov 0   ;;  %s828_s21 = smov 0  }
   0x5   :  { %s830_s22 = smov 0   ;;  %s832_s23 = smov 0  }
   0x6 LB: > { %s588_s24 = sadd.s32 4294967295, %s786_s23   ;;  %s589_s25 = sadd.s32 4294967294, %s786_s23   ;;  %s786_s23 = sphi %s832_s23, %s21_s23   ;;  %s782_s22 = sphi %s830_s22, %s991_s22   ;;  %s778_s21 = sphi %s828_s21, %s990_s21   ;;  %s774_s20 = sphi %s826_s20, %s989_s20   ;;  %s770_s19 = sphi %s824_s19, %s988_s19   ;;  %s766_s18 = sphi %s822_s18, %s987_s18  }
   0x7   : > { %s33_s26 = sadd.s32 1, %s782_s22  ;;  %s70_s27 = sadd.s32 1, %s774_s20 }
   0x8   : > { %p35_p0 = scmp.ge.s32.totalorder %s33_s26, 2  ;;  %p77_p1 = scmp.ne.s32.totalorder %s774_s20, %s770_s19 }
   0x9   : > { %p78_p2 = scmp.eq.s32.totalorder %s786_s23, 0  ;;  %p83_p3 = scmp.ne.s32.totalorder %s770_s19, %s766_s18 }
   0xa   : > { %s993_s26 = smov (%p35_p0, %s33_s26), 0  ;;  %p84_p5 = scmp.eq.s32.totalorder %s588_s24, 0 }
   0xb   : > { %p863_p4 = por %p78_p2, %p77_p1  ;;  %s65_s29 = ssub.s32 %s782_s22, %s993_s26 }
   0xc   : > { %p172_p6 = scmp.eq.s32.totalorder %s588_s24, 1  ;;  %p68_p7 = scmp.eq.s32.totalorder %s65_s29, 0 }
   0xd   : > { %p869_p8 = por %p84_p5, %p83_p3  ;;  %p178_p10 = scmp.eq.s32.totalorder %s589_s25, 1 }
   0xe   : > { %p873_p9 = por %p172_p6, %p77_p1  ;;  %p624_p13 = scmp.lt.s32.totalorder %s786_s23, 2 }
   0xf   : > { %s878_s7 = scalar_select %p68_p7, %s774_s20, %s70_s27  }
  0x10   : > { %p880_p11 = por %p178_p10, %p83_p3  ;;  %s220_s9 = sand.u32 1, %s774_s20  }
  0x11   : > { %s592_s10 = sshll.u32 %s220_s9, 4  ;;  %s609_s11 = sshll.u32 %s782_s22, 8 }
  0x12   : > { %s983_s8 = scalar_select %p880_p11, 1, 0 }
  0x13   : > { %s232_s14 = scalar_lea.hbm %s975_s1, %s609_s11  ;;  %s224_s15 = scalar_lea.vmem [#allocation2], %s592_s10 }
  0x14   : > { %s234_s16 = sshll.u32 %s224_s15, 4  ;;  %p893_p0 = pnand %p624_p13, %p863_p4  ;;  %s235_s16 = int_to_ptr.vmem [resolvable:$true] %s234_s16 }
  0x15   : > { %p595_p1 = scmp.ge.s32.totalorder %s786_s23, 1  ;;  %p239_p2 = scmp.lt.s32.totalorder %s786_s23, 3 }
  0x16   : > { %s221_s24 = scalar_lea.sflag [#allocation3], %s220_s9  ;;  %p680_p3 = pneg %p893_p0 }
  0x17   : > { %s691_s25 = scalar_lea.vmem %s235_s16, 256  ;;  %s788_s27 = smov [#allocation2]  }
  0x18   : > { %p692_p5 = scmp.ne.s32.totalorder %s235_s16, %s691_s25  ;;  %s696_s29 = sshll.u32 %s788_s27, 4  ;;  %s697_s29 = int_to_ptr.vmem [resolvable:$false] %s696_s29 }
  0x19   : > { %s698_s10 = scalar_lea.vmem %s697_s29, 512  ;;  %p699_p10 = scmp.lt.s32.totalorder %s235_s16, %s697_s29 }
  0x1a   : > { %p694_p6 = pnand %p692_p5, %p680_p3  ;;  %p700_p12 = scmp.lt.s32.totalorder %s698_s10, %s691_s25 }
  0x1c   : > { %p695_p7 = pneg %p694_p6  ;;  %p701_p4 = por %p700_p12, %p699_p10 }
  0x1e   : > { %p702_p13 = pnand %p701_p4, %p695_p7 }
  0x20   : > { %705 = shalt.err (!%p702_p13)
}
  0x21   : > { %619 = dma.hbm_to_vmem [thread:$0]  (!%p893_p0), %s232_s14, 256, %s235_s16, %s221_s24  }
  0x22   : > { %p240_p11 = pnand %p595_p1, %p239_p2 }
  0x23   : > { %s908_s28 = sand.u32 (!%p240_p11), 1, %s770_s19  }
  0x24   : > { %243 = sbr.rel (%p240_p11) target bundleno = 265 (0x109), region = 40  ;;  %s596_s9 = sshll.u32 (!%p240_p11), %s908_s28, 4 }
  0x25   : > { %s246_s11 = scalar_lea.sflag (!%p240_p11), [#allocation3], %s908_s28  ;;  %s249_s12 = scalar_lea.vmem (!%p240_p11), [#allocation2], %s596_s9 }
  0x29   : > { %757 = dma.done.wait (%p869_p8), %s246_s11, 256  }
  0x2a   : > { %759 = vsyncadd (%p869_p8), %s246_s11, 4294967040  ;;  %p286_p12 = scmp.lt.s32.totalorder %s778_s21, 1  ;;  %v789_v0 = vmov 0.0   ;;  %v790_v1 = vmov 0   ;;  %v301_v2 = vld [vmem:[%s249_s12 + $0x8] sm:$0xff]  ;;  %v300_v3 = vld [vmem:[%s249_s12] sm:$0xff] }
  0x2b   : > { %370 = vmatprep.mubr.f32.mxu0 %v789_v0  ;;  %452 = vmatprep.mubr.f32.mxu1 %v789_v0  ;;  %v299_v4 = vld [vmem:[%s977_s3] sm:$0xff]  ;;  %vm302_vm0 = vcmask 64512   ;;  %vm383_vm1 = vcmask 1043456   ;;  %vm379_vm2 = vcmask 31744   ;;  %s611_s11 = sshll.u32 %s778_s21, 8  ;;  %s284_s12 = scalar_lea.vmem [#allocation5], %s596_s9 }
  0x2c   : > { %s287_s13 = scalar_select %p286_p12, %s778_s21, 1  ;;  %676 = vset.pattern.permute.xlu0 %v790_v1  ;;  %336 = vmatprep.subr.mxu0 %v301_v2  ;;  %v459_v6 = vld [vmem:[%s978_s4] sm:$0xff] }
  0x2d   : > { %337 = vmatpush1.msra.mxu0 %v300_v3  ;;  %462 = vperm.xlu0 %676, %v459_v6   ;;  %v297_v8 = vld [vmem:[%s976_s2] sm:$0xff]  ;;  %s484_s16 = scalar_lea.hbm %s979_s5, %s611_s11  ;;  %s791_s21 = smov [#allocation5]  }
  0x2e   : > { %s610_s14 = sshll.u32 %s287_s13, 3  ;;  %600 = vmatmul.mubr.msk.f32.vlgmr.msra.gmra.mxu0 %vm302_vm0, %v299_v4  ;;  %s486_s13 = sshll.u32 %s284_s12, 4  ;;  %s487_s13 = int_to_ptr.vmem [resolvable:$true] %s486_s13 }
  0x2f   : > { %s293_s17 = scalar_lea.vmem %s974_s0, %s610_s14  ;;  %s706_s24 = scalar_lea.vmem %s487_s13, 256 }
  0x30   : > { %v298_v5 = vld [vmem:[%s293_s17] sm:$0xff]  ;;  %s470_s17 = scalar_lea.sflag [#allocation4], %s908_s28  ;;  %p707_p8 = scmp.ne.s32.totalorder %s487_s13, %s706_s24 }
  0x31   : > { %v378_v7 = vcombine.high %v298_v5, %v298_v5  ;;  %s710_s25 = sshll.u32 %s791_s21, 4  ;;  %s711_s25 = int_to_ptr.vmem [resolvable:$false] %s710_s25 }
  0x32   : > { %p708_p11 = pnand %p707_p8, %p873_p9  ;;  %s712_s9 = scalar_lea.vmem %s711_s25, 512 }
  0x33   : > { %601 = vmatprep.subr.msk.mxu1 %vm383_vm1, %v378_v7  ;;  %p713_p1 = scmp.lt.s32.totalorder %s487_s13, %s711_s25  ;;  %p714_p2 = scmp.lt.s32.totalorder %s712_s9, %s706_s24 }
  0x34   : > { %602 = vmatpush1.msk.msra.mxu1 %vm383_vm1, %v298_v5  ;;  %p709_p0 = pneg %p708_p11 }
  0x35   : > { %603 = vmatmul.mubr.msk.f32.vlgmr.msra.gmra.mxu1 %vm379_vm2, %v297_v8  ;;  %p715_p3 = por %p714_p2, %p713_p1 }
  0x37   : > { %p716_p5 = pnand %p715_p3, %p709_p0 }
  0xa8   : > { %v463_v11 = vpop.permute.xlu0 %462 }
  0xee   : > { %v372_v9 = vpop.f32.mrf.mxu0 }
  0xf0   : > { %v374_v13 = vpop.f32.mrf.mxu0 }
  0xf5   : > { %v454_v10 = vpop.f32.mrf.mxu1 }
  0xf6   : > { %v455_v12 = vadd.f32 %v454_v10, %v372_v9 }
  0xf7   : > { %v456_v14 = vpop.f32.mrf.mxu1 }
  0xf8   : > { %v465_v15 = vadd.f32 %v463_v11, %v455_v12  ;;  %v457_v16 = vadd.f32 %v456_v14, %v374_v13 }
  0xfa   : > { %467 = vst [vmem:[%s284_s12] sm:$0xff] %v465_v15  ;;  %v466_v17 = vadd.f32 %v463_v11, %v457_v16 }
  0xfc   : > { %468 = vst [vmem:[%s284_s12 + $0x8] sm:$0xff] %v466_v17 }
  0xfd   : > { %719 = shalt.err (!%p716_p5)
}
  0xfe   : > { %s720_s30 = scalar_lea.hbm %s484_s16, 256  ;;  %s724_s29 = scalar_lea.hbm %s979_s5, 512 }
  0xff   : > { %p721_p6 = scmp.ne.s32.totalorder %s484_s16, %s720_s30  ;;  %p725_p4 = scmp.lt.s32.totalorder %s484_s16, %s979_s5 }
 0x100   : > { %p726_p13 = scmp.lt.s32.totalorder %s724_s29, %s720_s30 }
 0x101   : > { %p722_p7 = pnand %p721_p6, %p873_p9 }
 0x102   : > { %p727_p12 = por %p726_p13, %p725_p4 }
 0x103   : > { %p723_p10 = pneg %p722_p7 }
 0x105   : > { %p728_p8 = pnand %p727_p12, %p723_p10 }
 0x107   : > { %731 = shalt.err (!%p728_p8)
}
 0x108   : > { %614 = dma.vmem_to_hbm [thread:$0]  (%p873_p9), %s487_s13, 256, %s484_s16, %s470_s17  }
 0x109 PF: > { %s498_s12 = sand.u32 1, %s766_s18   ;;  %p985_p11 = scmp.ne.s32.totalorder %s983_s8, 0 }
 0x10a   : > { %p986_p0 = scmp.ge.s32.totalorder %s786_s23, 2  ;;  %s499_s14 = scalar_lea.sflag [#allocation4], %s498_s12 }
 0x10c   : > { %p621_p1 = pnand %p986_p0, %p985_p11 }
 0x10e   : > { %p622_p2 = pneg %p621_p1 }
 0x110   : > { %761 = dma.done.wait (%p622_p2), %s499_s14, 256  }
 0x111   : > { %763 = vsyncadd (%p622_p2), %s499_s14, 4294967040  ;;  %s21_s23 = sadd.s32 1, %s786_s23   ;;  %s987_s18 = smov %s770_s19 }
 0x112   : > { %p18_p3 = scmp.ge.s32.totalorder %s21_s23, 4   ;;  %s988_s19 = smov %s774_s20 }
 0x113   : > { %s989_s20 = smov %s878_s7  ;;  %s990_s21 = smov %s782_s22 }
 0x114   : > { %s991_s22 = smov %s993_s26  ;;  %20 = sbr.rel (!%p18_p3) target bundleno = 6 (0x6), region = 88 }
 0x119   :  { %504 = vsyncpa [#allocation3], 1 }
 0x11a   :  { %506 = vsyncpa [#allocation3 + $0x1], 1 }
 0x11b   :  { %507 = vsyncpa [#allocation4], 1 }
 0x11c   :  { %509 = vsyncpa [#allocation4 + $0x1], 1 }

</bundles_post_ra>
